<compile_context>
chip_gen: v5e
topology: v5e:2x2
jax: 0.10.0
libtpu: 0.0.40
codegen_flags: <defaults>
</compile_context>

<pallas_src>
import jax
import jax.numpy as jnp
from jax.experimental import pallas as pl
from jax.experimental.pallas import tpu as pltpu


_GATHER_WINDOW = 16  # max in-flight per-row gather DMAs (bounds DMA semaphore usage)


def _round_up(x, m):
    return (x + m - 1) // m * m


def encoder_kernel(idx_ref, emb_hbm, w_ref, b_ref, out_ref, emb_vmem, sems):
    """One token tile of fused gather + linear projection.

    idx_ref : (Np,)    int32  SMEM (scalar prefetch) padded token indices
    emb_hbm : (V, E)   f32    HBM (pl.ANY)           embedding table
    w_ref   : (E, Hp)  f32    VMEM resident          linear weight (transposed, H padded)
    b_ref   : (1, Hp)  f32    VMEM resident          linear bias (H padded)
    out_ref : (tm, Hp) f32    VMEM                   output tile (lane-dense)
    emb_vmem: (tm, E)  f32    VMEM scratch           gathered embedding rows
    sems    : (_GATHER_WINDOW,) DMA semaphores
    """
    t = pl.program_id(0)
    tm = out_ref.shape[0]
    base = t * tm

    def row_dma(row_slot, src_row):
        return pltpu.make_async_copy(
            emb_hbm.at[pl.ds(src_row, 1)],
            emb_vmem.at[pl.ds(row_slot, 1)],
            sems.at[row_slot & (_GATHER_WINDOW - 1)],
        )

    # Gather tm arbitrary rows from the HBM table, keeping at most
    # _GATHER_WINDOW row DMAs in flight (sliding window over the semaphores).
    @pl.loop(0, tm)
    def _(r):
        @pl.when(r >= _GATHER_WINDOW)
        def _():
            row_dma(r - _GATHER_WINDOW, 0).wait()

        row_dma(r, idx_ref[base + r]).start()

    @pl.loop(max(tm - _GATHER_WINDOW, 0), tm)
    def _(r):
        row_dma(r, 0).wait()

    # (tm, E) @ (E, Hp) on the MXU with fp32 accumulation; lane-dense store.
    out = jnp.dot(emb_vmem[...], w_ref[...], preferred_element_type=jnp.float32)
    out_ref[...] = (out + b_ref[...]).astype(out_ref.dtype)


def _gather_project(idx, emb_table, w, b):
    """idx: (N,) int32 -> (N, H) f32 where out[n] = emb_table[idx[n]] @ w + b."""
    (N,) = idx.shape
    _, E = emb_table.shape
    H = w.shape[1]

    Hp = _round_up(H, 128)                      # lane-dense output
    tm = 128 if N >= 128 else _round_up(N, 8)   # token rows per grid step
    Np = _round_up(N, tm)

    idx_p = jnp.pad(idx.astype(jnp.int32), (0, Np - N))     # pad with valid index 0
    w_p = jnp.pad(w.astype(jnp.float32), ((0, 0), (0, Hp - H)))
    b_p = jnp.pad(b.astype(jnp.float32), (0, Hp - H)).reshape(1, Hp)

    grid_spec = pltpu.PrefetchScalarGridSpec(
        num_scalar_prefetch=1,
        grid=(Np // tm,),
        in_specs=[
            pl.BlockSpec(memory_space=pl.ANY),                      # table stays in HBM
            pl.BlockSpec((E, Hp), lambda t, idx_s: (0, 0)),         # W resident in VMEM
            pl.BlockSpec((1, Hp), lambda t, idx_s: (0, 0)),         # bias resident in VMEM
        ],
        out_specs=pl.BlockSpec((tm, Hp), lambda t, idx_s: (t, 0)),
        scratch_shapes=[
            pltpu.VMEM((tm, E), jnp.float32),
            pltpu.SemaphoreType.DMA((_GATHER_WINDOW,)),
        ],
    )

    out = pl.pallas_call(
        encoder_kernel,
        out_shape=jax.ShapeDtypeStruct((Np, Hp), jnp.float32),
        grid_spec=grid_spec,
        compiler_params=pltpu.CompilerParams(
            dimension_semantics=("parallel",),
            vmem_limit_bytes=32 * 1024 * 1024,
        ),
    )(idx_p, emb_table.astype(jnp.float32), w_p, b_p)

    return out[:N, :H]


def encoder_forward(sent1, sent2, params):
    """Mirrors encoder.forward: returns (s1_input, s2_input), each [B, S, H]."""
    emb_table = params["embedding"]
    w = params["linear_w"]   # (E, H)
    b = params["linear_b"]   # (H,)
    B, S = sent1.shape
    H = w.shape[1]

    # Fuse both sentences into one pallas_call: halves W/b traffic and launch overhead.
    idx = jnp.concatenate([sent1.reshape(-1), sent2.reshape(-1)], axis=0).astype(jnp.int32)
    out = _gather_project(idx, emb_table, w, b)              # (2*B*S, H)

    n = B * S
    s1_input = out[:n].reshape(B, S, H)
    s2_input = out[n:].reshape(B, S, H)
    return s1_input, s2_input


def init_params(key, num_embeddings, embedding_size, hidden_size):
    """Deterministic synthetic parameters (shapes match nn.Embedding / nn.Linear)."""
    k_emb, k_w, k_b = jax.random.split(key, 3)
    embedding = jax.random.normal(k_emb, (num_embeddings, embedding_size), jnp.float32)
    bound = 1.0 / jnp.sqrt(embedding_size)
    # PyTorch Linear stores weight as (H, E); keep math identical, store transposed.
    linear_w = jax.random.uniform(
        k_w, (embedding_size, hidden_size), jnp.float32, minval=-bound, maxval=bound)
    linear_b = jax.random.uniform(
        k_b, (hidden_size,), jnp.float32, minval=-bound, maxval=bound)
    return {"embedding": embedding, "linear_w": linear_w, "linear_b": linear_b}


if __name__ == "__main__":
    num_embeddings = 64
    embedding_size = 32
    hidden_size = 32
    batch, seq = 2, 8

    key = jax.random.PRNGKey(0)
    k_params, k_s1, k_s2 = jax.random.split(key, 3)

    params = init_params(k_params, num_embeddings, embedding_size, hidden_size)
    sent1 = jax.random.randint(k_s1, (batch, seq), 0, num_embeddings, jnp.int32)
    sent2 = jax.random.randint(k_s2, (batch, seq), 0, num_embeddings, jnp.int32)

    s1_input, s2_input = encoder_forward(sent1, sent2, params)
    jax.block_until_ready((s1_input, s2_input))

    # Pure-JAX reference check (embed -> linear).
    def ref(sent):
        emb = jnp.take(params["embedding"], sent, axis=0)
        return emb @ params["linear_w"] + params["linear_b"]

    assert s1_input.shape == (batch, seq, hidden_size)
    assert s2_input.shape == (batch, seq, hidden_size)
    assert jnp.allclose(s1_input, ref(sent1), atol=1e-5)
    assert jnp.allclose(s2_input, ref(sent2), atol=1e-5)

    print("KERNEL_OK")
</pallas_src>

<mosaic_0001>
module attributes {stable_mosaic.version = 11 : i64} {
  func.func @encoder_kernel(%arg0: i32, %arg1: memref<32xi32, #tpu.memory_space<smem>>, %arg2: memref<64x32xf32, #tpu.memory_space<any>>, %arg3: memref<32x128xf32, #tpu.memory_space<vmem>>, %arg4: memref<1x128xf32, #tpu.memory_space<vmem>>, %arg5: memref<32x128xf32, #tpu.memory_space<vmem>>, %arg6: memref<32x32xf32, #tpu.memory_space<vmem>>, %arg7: memref<16x!tpu.dma_semaphore, #tpu.memory_space<semaphore_mem>>) attributes {dimension_semantics = [#tpu.dimension_semantics<parallel>], iteration_bounds = array<i64: 1>, scalar_prefetch = 1 : i64, scratch_operands = 2 : i64, tpu.core_type = #tpu.core_type<tc>, window_params = [{}, {pipeline_mode = #tpu.pipeline_mode<synchronous>, transform_indices = @transform_1, window_bounds = array<i64: 32, 128>}, {pipeline_mode = #tpu.pipeline_mode<synchronous>, transform_indices = @transform_2, window_bounds = array<i64: 1, 128>}, {transform_indices = @transform_3, window_bounds = array<i64: 32, 128>}]} {
    %c32_i32 = arith.constant 32 : i32
    %0 = arith.muli %arg0, %c32_i32 : i32
    %c0_i32 = arith.constant 0 : i32
    %c32_i32_0 = arith.constant 32 : i32
    %1 = arith.addi %c0_i32, %c32_i32_0 : i32
    %c1_i32 = arith.constant 1 : i32
    scf.for %arg8 = %c0_i32 to %1 step %c1_i32  : i32 {
      %c1_i32_12 = arith.constant 1 : i32
      %10 = arith.muli %arg8, %c1_i32_12 : i32
      %c0_i32_13 = arith.constant 0 : i32
      %11 = arith.addi %c0_i32_13, %10 : i32
      %c16_i32_14 = arith.constant 16 : i32
      %12 = arith.cmpi sge, %11, %c16_i32_14 : i32
      %13 = arith.extui %12 : i1 to i32
      %c0_i32_15 = arith.constant 0 : i32
      %14 = arith.cmpi ne, %13, %c0_i32_15 : i32
      scf.if %14 {
        %c16_i32_18 = arith.constant 16 : i32
        %23 = arith.subi %11, %c16_i32_18 : i32
        %c15_i32_19 = arith.constant 15 : i32
        %24 = arith.andi %23, %c15_i32_19 : i32
        %c0_i32_20 = arith.constant 0 : i32
        %c0_i32_21 = arith.constant 0 : i32
        %25 = tpu.memref_slice %arg2[%c0_i32_20, %c0_i32_21] : memref<64x32xf32, #tpu.memory_space<any>> -> memref<1x32xf32, #tpu.memory_space<any>>
        %c0_i32_22 = arith.constant 0 : i32
        %26 = tpu.memref_slice %arg6[%23, %c0_i32_22] : memref<32x32xf32, #tpu.memory_space<vmem>> -> memref<1x32xf32, #tpu.memory_space<vmem>>
        %27 = tpu.memref_slice %arg7[%24] : memref<16x!tpu.dma_semaphore, #tpu.memory_space<semaphore_mem>> -> memref<1x!tpu.dma_semaphore, #tpu.memory_space<semaphore_mem>>
        %28 = tpu.memref_squeeze %27 : memref<1x!tpu.dma_semaphore, #tpu.memory_space<semaphore_mem>> -> memref<!tpu.dma_semaphore, #tpu.memory_space<semaphore_mem>>
        tpu.wait_dma2 semaphore(%28 : memref<!tpu.dma_semaphore, #tpu.memory_space<semaphore_mem>>) src(%25 : memref<1x32xf32, #tpu.memory_space<any>>) dst(%26 : memref<1x32xf32, #tpu.memory_space<vmem>>)
      } else {
      }
      %15 = arith.addi %0, %11 : i32
      %16 = arith.index_cast %15 : i32 to index
      %17 = memref.load %arg1[%16] : memref<32xi32, #tpu.memory_space<smem>>
      %c15_i32 = arith.constant 15 : i32
      %18 = arith.andi %11, %c15_i32 : i32
      %c0_i32_16 = arith.constant 0 : i32
      %19 = tpu.memref_slice %arg2[%17, %c0_i32_16] : memref<64x32xf32, #tpu.memory_space<any>> -> memref<1x32xf32, #tpu.memory_space<any>>
      %c0_i32_17 = arith.constant 0 : i32
      %20 = tpu.memref_slice %arg6[%11, %c0_i32_17] : memref<32x32xf32, #tpu.memory_space<vmem>> -> memref<1x32xf32, #tpu.memory_space<vmem>>
      %21 = tpu.memref_slice %arg7[%18] : memref<16x!tpu.dma_semaphore, #tpu.memory_space<semaphore_mem>> -> memref<1x!tpu.dma_semaphore, #tpu.memory_space<semaphore_mem>>
      %22 = tpu.memref_squeeze %21 : memref<1x!tpu.dma_semaphore, #tpu.memory_space<semaphore_mem>> -> memref<!tpu.dma_semaphore, #tpu.memory_space<semaphore_mem>>
      tpu.enqueue_dma source(%19 : memref<1x32xf32, #tpu.memory_space<any>>) target(%20 : memref<1x32xf32, #tpu.memory_space<vmem>>) target_semaphore(%22 : memref<!tpu.dma_semaphore, #tpu.memory_space<semaphore_mem>>)
    }
    %c32_i32_1 = arith.constant 32 : i32
    %c0_i32_2 = arith.constant 0 : i32
    %c16_i32 = arith.constant 16 : i32
    %2 = arith.addi %c0_i32_2, %c16_i32 : i32
    %c1_i32_3 = arith.constant 1 : i32
    scf.for %arg8 = %c0_i32_2 to %2 step %c1_i32_3  : i32 {
      %c1_i32_12 = arith.constant 1 : i32
      %10 = arith.muli %arg8, %c1_i32_12 : i32
      %c16_i32_13 = arith.constant 16 : i32
      %11 = arith.addi %c16_i32_13, %10 : i32
      %c15_i32 = arith.constant 15 : i32
      %12 = arith.andi %11, %c15_i32 : i32
      %c0_i32_14 = arith.constant 0 : i32
      %c0_i32_15 = arith.constant 0 : i32
      %13 = tpu.memref_slice %arg2[%c0_i32_14, %c0_i32_15] : memref<64x32xf32, #tpu.memory_space<any>> -> memref<1x32xf32, #tpu.memory_space<any>>
      %c0_i32_16 = arith.constant 0 : i32
      %14 = tpu.memref_slice %arg6[%11, %c0_i32_16] : memref<32x32xf32, #tpu.memory_space<vmem>> -> memref<1x32xf32, #tpu.memory_space<vmem>>
      %15 = tpu.memref_slice %arg7[%12] : memref<16x!tpu.dma_semaphore, #tpu.memory_space<semaphore_mem>> -> memref<1x!tpu.dma_semaphore, #tpu.memory_space<semaphore_mem>>
      %16 = tpu.memref_squeeze %15 : memref<1x!tpu.dma_semaphore, #tpu.memory_space<semaphore_mem>> -> memref<!tpu.dma_semaphore, #tpu.memory_space<semaphore_mem>>
      tpu.wait_dma2 semaphore(%16 : memref<!tpu.dma_semaphore, #tpu.memory_space<semaphore_mem>>) src(%13 : memref<1x32xf32, #tpu.memory_space<any>>) dst(%14 : memref<1x32xf32, #tpu.memory_space<vmem>>)
    }
    %c16_i32_4 = arith.constant 16 : i32
    %c0 = arith.constant 0 : index
    %c0_5 = arith.constant 0 : index
    %3 = vector.load %arg6[%c0, %c0_5] : memref<32x32xf32, #tpu.memory_space<vmem>>, vector<32x32xf32>
    %c0_6 = arith.constant 0 : index
    %c0_7 = arith.constant 0 : index
    %4 = vector.load %arg3[%c0_6, %c0_7] : memref<32x128xf32, #tpu.memory_space<vmem>>, vector<32x128xf32>
    %cst = arith.constant dense<0.000000e+00> : vector<32x128xf32>
    %5 = tpu.matmul %3, %4, %cst {dimension_numbers = #tpu.dot_dimension_numbers<[1], [0], [0], [1], [0, 0, 1, 1], [], []>} : vector<32x32xf32>, vector<32x128xf32>, vector<32x128xf32> -> vector<32x128xf32>
    %c0_8 = arith.constant 0 : index
    %c0_9 = arith.constant 0 : index
    %6 = vector.load %arg4[%c0_8, %c0_9] : memref<1x128xf32, #tpu.memory_space<vmem>>, vector<1x128xf32>
    %7 = vector.broadcast %6 : vector<1x128xf32> to vector<32x128xf32>
    %8 = arith.addf %5, %7 : vector<32x128xf32>
    %c0_10 = arith.constant 0 : index
    %c0_11 = arith.constant 0 : index
    %9 = vector.load %arg5[%c0_10, %c0_11] : memref<32x128xf32, #tpu.memory_space<vmem>>, vector<32x128xf32>
    tpu.vector_store %arg5[%c0_10, %c0_11], %8 {strides = array<i32>} : memref<32x128xf32, #tpu.memory_space<vmem>>, vector<32x128xf32>,
    return
  }
  func.func @transform_1(%arg0: i32, %arg1: memref<32xi32, #tpu.memory_space<smem>>) -> (i32, i32) {
    %c0_i32 = arith.constant 0 : i32
    %c0_i32_0 = arith.constant 0 : i32
    %c0_i32_1 = arith.constant 0 : i32
    return %c0_i32, %c0_i32_0 : i32, i32
  }
  func.func @transform_2(%arg0: i32, %arg1: memref<32xi32, #tpu.memory_space<smem>>) -> (i32, i32) {
    %c0_i32 = arith.constant 0 : i32
    %c0_i32_0 = arith.constant 0 : i32
    %c0_i32_1 = arith.constant 0 : i32
    return %c0_i32, %c0_i32_0 : i32, i32
  }
  func.func @transform_3(%arg0: i32, %arg1: memref<32xi32, #tpu.memory_space<smem>>) -> (i32, i32) {
    %c0_i32 = arith.constant 0 : i32
    %c0_i32_0 = arith.constant 0 : i32
    return %arg0, %c0_i32 : i32, i32
  }
}

</mosaic_0001>

<bundles_post_ra>
// kernel: tpu_custom_call.1
= control target key start
LH: loop header
LB: loop body
LE: loop exit
PB: predicated region body
PF: predicated region fallthrough
CT: control target
= control target key end

     0   :  { %s417_s18 = smov [#allocation5]   ;;  %s470_s0 = inlined_call_operand.vmem [shape: s32[32], index: 0, kind: input, shape index: {}]   ;;  %s471_s1 = inlined_call_operand.vmem [shape: f32[64,32], index: 1, kind: input, shape index: {}]   ;;  %s472_s2 = inlined_call_operand.vmem [shape: f32[32,128], index: 2, kind: input, shape index: {}]   ;;  %s473_s3 = inlined_call_operand.vmem [shape: f32[1,128], index: 3, kind: input, shape index: {}]   ;;  %s474_s4 = inlined_call_operand.hbm [shape: f32[32,128], index: 4, kind: output, shape index: {}]  }
   0x1   :  { %s10_s17 = sshll.u32 %s470_s0, 4  ;;  %s11_s17 = int_to_ptr.vmem [resolvable:$true] %s10_s17 }
   0x2   :  { %13 = dma.vmem_to_smem %s11_s17, 16, %s417_s18, [#allocation4] }
   0x3   :  { %399 = dma.done.wait [#allocation4], 16 }
   0x4   :  { %400 = vsyncadd [#allocation4], 4294967280 }
   0x5   :  { %16 = sfence }
   0x6   :  { %17 = vsyncpa [#allocation7], 0  ;;  %s409_s19 = smov 0  }
   0x7 LB: > { %p333_p0 = scmp.ge.s32.totalorder %s411_s19, 16  ;;  %s298_s20 = sadd.s32 4294967280, %s411_s19  ;;  %s411_s19 = sphi %s409_s19, %s28_s19  }
   0x8   : > { %s34_s21 = sand.u32 15, %s298_s20 }
   0x9   : > { %s35_s22 = scalar_lea.sflag [#allocation3], %s34_s21 }
   0xa   : > { %402 = dma.done.wait (%p333_p0), %s35_s22, 16 }
   0xb   : > { %404 = vsyncadd (%p333_p0), %s35_s22, 4294967280  ;;  %s41_s23 = sand.u32 15, %s411_s19  ;;  %s40_s24 = sld [smem:[#allocation5 + %s411_s19]] }
   0xc   : > { %s43_s27 = scalar_lea.vmem [#allocation2], %s411_s19  ;;  %s44_s28 = scalar_lea.sflag [#allocation3], %s41_s23 }
  0x11   : > { %s42_s26 = scalar_lea.vmem %s471_s1, %s40_s24 }
  0x12   : > { %v59_v0 = vld [vmem:[%s42_s26] sm:$0x1] }
  0x13   : > { %60 = vst [vmem:[%s43_s27] sm:$0x1] %v59_v0 }
  0x14   : > { %78 = vsyncadd %s44_s28, 16  ;;  %s28_s19 = sadd.s32 1, %s411_s19  }
  0x15   : > { %p25_p1 = scmp.ge.s32.totalorder %s28_s19, 32  }
  0x16   :  { %s413_s29 = smov (%p25_p1), 0  }
  0x17   :  { %27 = sbr.rel (!%p25_p1) target bundleno = 7 (0x7), region = 100 }
  0x1c LB: > { %s85_s30 = sadd.s32 16, %s415_s29  ;;  %s415_s29 = sphi %s413_s29, %s84_s29  }
  0x1d   : > { %s86_s5 = sand.u32 15, %s85_s30 }
  0x1e   : > { %s87_s6 = scalar_lea.sflag [#allocation3], %s86_s5 }
  0x1f   : > { %405 = dma.done.wait %s87_s6, 16 }
  0x20   : > { %406 = vsyncadd %s87_s6, 4294967280  ;;  %s84_s29 = sadd.s32 1, %s415_s29  }
  0x21   : > { %p81_p2 = scmp.ge.s32.totalorder %s84_s29, 16  }
  0x22   :  { %v98_v1 = vld [vmem:[%s472_s2 + $0x18] sm:$0xff] (%p81_p2)  ;;  %v97_v2 = vld [vmem:[%s472_s2 + $0x10] sm:$0xff] (%p81_p2)  ;;  %v96_v3 = vld [vmem:[%s472_s2 + $0x8] sm:$0xff] (%p81_p2)  ;;  %vm103_vm0 = vcmask (%p81_p2), 261120   ;;  %s418_s15 = smov (%p81_p2), [#allocation6]   ;;  %s155_s19 = sshll.u32 (%p81_p2), %s474_s4, 4  ;;  %s156_s19 = int_to_ptr.hbm [resolvable:$true] %s155_s19 }
  0x23   :  { %83 = sbr.rel (!%p81_p2) target bundleno = 28 (0x1c), region = 111  ;;  %320 = vmatpush.msra.mxu2 (%p81_p2), %v98_v1  ;;  %321 = vmatpush.msra.mxu3 (%p81_p2), %v98_v1  ;;  %v95_v4 = vld [vmem:[%s472_s2] sm:$0xff] (%p81_p2)  ;;  %v93_v5 = vld [vmem:[#allocation2 + $0x10] sm:$0xff] (%p81_p2)  ;;  %v94_v6 = vld [vmem:[#allocation2 + $0x18] sm:$0xff] (%p81_p2)  ;;  %s153_s16 = sshll.u32 (%p81_p2), %s418_s15, 4  ;;  %s154_s16 = int_to_ptr.vmem [resolvable:$true] %s153_s16 }
  0x24   :  { %128 = vmatpush.msra.mxu0 (%p81_p2), %v98_v1  ;;  %319 = vmatpush.msra.mxu1 (%p81_p2), %v98_v1  ;;  %v91_v7 = vld [vmem:[#allocation2] sm:$0xff] (%p81_p2)  ;;  %v92_v8 = vld [vmem:[#allocation2 + $0x8] sm:$0xff] (%p81_p2)  ;;  %s420_s20 = smov (%p81_p2), 8  }
  0x25   :  { %323 = vmatpush.msra.mxu2 (%p81_p2), %v97_v2  ;;  %324 = vmatpush.msra.mxu3 (%p81_p2), %v97_v2  ;;  %v354_v9 = vld [vmem:[%s473_s3] ss:$0 sm:$0xff] (%p81_p2)  ;;  %s419_s3 = smov (%p81_p2), 128  }
  0x26   :  { %129 = vmatpush.msra.mxu0 (%p81_p2), %v97_v2  ;;  %322 = vmatpush.msra.mxu1 (%p81_p2), %v97_v2 }
  0x27   :  { %326 = vmatpush.msra.mxu2 (%p81_p2), %v96_v3  ;;  %327 = vmatpush.msra.mxu3 (%p81_p2), %v96_v3 }
  0x28   :  { %130 = vmatpush.msra.mxu0 %v96_v3  ;;  %325 = vmatpush.msra.mxu1 %v96_v3 }
  0x29   :  { %329 = vmatpush.msra.mxu2 %v95_v4  ;;  %330 = vmatpush.msra.mxu3 %v95_v4 }
  0x2a   :  { %301 = vmatmul.msk.f32.vlgmr.msra.gmra.mxu2 %vm103_vm0, %v93_v5  ;;  %302 = vmatmul.msk.f32.vlgmr.msra.gmra.mxu3 %vm103_vm0, %v94_v6 }
  0x2b   :  { %131 = vmatpush.msra.mxu0 %v95_v4  ;;  %328 = vmatpush.msra.mxu1 %v95_v4 }
  0x2c   :  { %299 = vmatmul.msk.f32.vlgmr.msra.gmra.mxu0 %vm103_vm0, %v91_v7  ;;  %300 = vmatmul.msk.f32.vlgmr.msra.gmra.mxu1 %vm103_vm0, %v92_v8 }
  0xa9   :  { %v133_v10 = vpop.f32.mrf.mxu0  ;;  %v136_v11 = vpop.f32.mrf.mxu1 }
  0xaa   :  { %v134_v12 = vadd.f32 %v354_v9, %v133_v10  ;;  %v137_v13 = vadd.f32 %v354_v9, %v136_v11 }
  0xac   :  { %145 = vst [vmem:[#allocation6] sm:$0xff] %v134_v12 }
  0xad   :  { %146 = vst [vmem:[#allocation6 + $0x8] sm:$0xff] %v137_v13  ;;  %v139_v14 = vpop.f32.mrf.mxu2  ;;  %v142_v15 = vpop.f32.mrf.mxu3 }
  0xae   :  { %v140_v16 = vadd.f32 %v354_v9, %v139_v14  ;;  %v143_v17 = vadd.f32 %v354_v9, %v142_v15 }
  0xb0   :  { %147 = vst [vmem:[#allocation6 + $0x10] sm:$0xff] %v140_v16 }
  0xb1   :  { %148 = vst [vmem:[#allocation6 + $0x18] sm:$0xff] %v143_v17 }
  0xb2   :  { %161 = dma.vmem_to_hbm [thread:$0]  %s154_s16, 512, %s156_s19, [#allocation7], %s419_s3, %s419_s3, %s420_s20  }
  0xb3   :  { %407 = dma.done.wait [#allocation7], 512  }
  0xb4   :  { %408 = vsyncadd [#allocation7], 4294966784 }
  0xb5   :  { %166 = vsyncpa [#allocation7], 1 }
  0xb6   :  { %167 = vsyncmov [#allocation3] }
  0xb9   :  { %s168_s21 = vpop.sfrf %167 }
  0xba   :  { %p303_p3 = scmp.ne.s32.totalorder %s168_s21, 0 }
  0xbc   :  { %172 = shalt.err (%p303_p3)  }
  0xbd   :  { %174 = vsyncmov [#allocation3 + $0x1] }
  0xc0   :  { %s175_s4 = vpop.sfrf %174 }
  0xc1   :  { %p304_p4 = scmp.ne.s32.totalorder %s175_s4, 0 }
  0xc3   :  { %179 = shalt.err (%p304_p4)  }
  0xc4   :  { %181 = vsyncmov [#allocation3 + $0x2] }
  0xc7   :  { %s182_s22 = vpop.sfrf %181 }
  0xc8   :  { %p305_p5 = scmp.ne.s32.totalorder %s182_s22, 0 }
  0xca   :  { %186 = shalt.err (%p305_p5)  }
  0xcb   :  { %188 = vsyncmov [#allocation3 + $0x3] }
  0xce   :  { %s189_s23 = vpop.sfrf %188 }
  0xcf   :  { %p306_p6 = scmp.ne.s32.totalorder %s189_s23, 0 }
  0xd1   :  { %193 = shalt.err (%p306_p6)  }
  0xd2   :  { %195 = vsyncmov [#allocation3 + $0x4] }
  0xd5   :  { %s196_s24 = vpop.sfrf %195 }
  0xd6   :  { %p307_p7 = scmp.ne.s32.totalorder %s196_s24, 0 }
  0xd8   :  { %200 = shalt.err (%p307_p7)  }
  0xd9   :  { %202 = vsyncmov [#allocation3 + $0x5] }
  0xdc   :  { %s203_s0 = vpop.sfrf %202 }
  0xdd   :  { %p308_p8 = scmp.ne.s32.totalorder %s203_s0, 0 }
  0xdf   :  { %207 = shalt.err (%p308_p8)  }
  0xe0   :  { %209 = vsyncmov [#allocation3 + $0x6] }
  0xe3   :  { %s210_s25 = vpop.sfrf %209 }
  0xe4   :  { %p309_p9 = scmp.ne.s32.totalorder %s210_s25, 0 }
  0xe6   :  { %214 = shalt.err (%p309_p9)  }
  0xe7   :  { %216 = vsyncmov [#allocation3 + $0x7] }
  0xea   :  { %s217_s26 = vpop.sfrf %216 }
  0xeb   :  { %p310_p10 = scmp.ne.s32.totalorder %s217_s26, 0 }
  0xed   :  { %221 = shalt.err (%p310_p10)  }
  0xee   :  { %223 = vsyncmov [#allocation3 + $0x8] }
  0xf1   :  { %s224_s27 = vpop.sfrf %223 }
  0xf2   :  { %p311_p11 = scmp.ne.s32.totalorder %s224_s27, 0 }
  0xf4   :  { %228 = shalt.err (%p311_p11)  }
  0xf5   :  { %230 = vsyncmov [#allocation3 + $0x9] }
  0xf8   :  { %s231_s28 = vpop.sfrf %230 }
  0xf9   :  { %p312_p12 = scmp.ne.s32.totalorder %s231_s28, 0 }
  0xfb   :  { %235 = shalt.err (%p312_p12)  }
  0xfc   :  { %237 = vsyncmov [#allocation3 + $0xa] }
  0xff   :  { %s238_s29 = vpop.sfrf %237 }
 0x100   :  { %p313_p13 = scmp.ne.s32.totalorder %s238_s29, 0 }
 0x102   :  { %242 = shalt.err (%p313_p13)  }
 0x103   :  { %244 = vsyncmov [#allocation3 + $0xb] }
 0x106   :  { %s245_s30 = vpop.sfrf %244 }
 0x107   :  { %p314_p0 = scmp.ne.s32.totalorder %s245_s30, 0 }
 0x109   :  { %249 = shalt.err (%p314_p0)  }
 0x10a   :  { %251 = vsyncmov [#allocation3 + $0xc] }
 0x10d   :  { %s252_s5 = vpop.sfrf %251 }
 0x10e   :  { %p315_p1 = scmp.ne.s32.totalorder %s252_s5, 0 }
 0x110   :  { %256 = shalt.err (%p315_p1)  }
 0x111   :  { %258 = vsyncmov [#allocation3 + $0xd] }
 0x114   :  { %s259_s6 = vpop.sfrf %258 }
 0x115   :  { %p316_p2 = scmp.ne.s32.totalorder %s259_s6, 0 }
 0x117   :  { %263 = shalt.err (%p316_p2)  }
 0x118   :  { %265 = vsyncmov [#allocation3 + $0xe] }
 0x11b   :  { %s266_s7 = vpop.sfrf %265 }
 0x11c   :  { %p317_p3 = scmp.ne.s32.totalorder %s266_s7, 0 }
 0x11e   :  { %270 = shalt.err (%p317_p3)  }
 0x11f   :  { %272 = vsyncmov [#allocation3 + $0xf] }
 0x122   :  { %s273_s8 = vpop.sfrf %272 }
 0x123   :  { %p318_p4 = scmp.ne.s32.totalorder %s273_s8, 0 }
 0x125   :  { %277 = shalt.err (%p318_p4)  }

</bundles_post_ra>
